<compile_context>
chip_gen: v6e
topology: v6e:2x2x1
jax: 0.10.0
libtpu: 0.0.40
codegen_flags: <defaults>
</compile_context>

<pallas_src>
import functools

import jax
import jax.numpy as jnp
from jax import lax
from jax.experimental import pallas as pl
from jax.experimental.pallas import tpu as pltpu


def _cdiv(a, b):
    return (a + b - 1) // b


def _round_up(a, b):
    return _cdiv(a, b) * b


def _chip_config():
    """(ncore_split, max_tile_rows, vmem_limit_bytes) per TPU generation."""
    try:
        kind = jax.devices()[0].device_kind.lower()
    except Exception:  # pragma: no cover
        kind = ""
    if "v7" in kind:
        # 2 TensorCores, 64 MiB VMEM/TC, ~3.2 TB/s HBM: big tiles + 2-way split.
        # TODO(synk): sweep pltpu.CORE_PARALLEL / pl.Buffered(3) on v7x.
        return 2, 2048, 48 << 20
    if "v6" in kind:
        # Single TC, 128 MiB VMEM: 1024-row tiles, no core split.
        return 1, 1024, 64 << 20
    # v5e and unknown chips: conservative defaults (16 MiB scoped-VMEM default).
    return 1, 512, None


def _vae_loss_kernel(dec_ref, y_ref, mu_ref, logvar_ref, sse_ref, kld_ref, *,
                     tile_rows, slab_rows, tiles_per_core, rows_valid,
                     may_be_partial, unroll):
    ci = pl.program_id(0)   # "parallel" core-split axis
    t = pl.program_id(1)    # "arbitrary" streaming / reduction axis
    cols = dec_ref.shape[1]
    n_slabs = tile_rows // slab_rows

    @pl.when(t == 0)
    def _init():
        sse_ref[...] = jnp.zeros_like(sse_ref)
        kld_ref[...] = jnp.zeros_like(kld_ref)

    @pl.when(jnp.logical_and(t == 0, ci == 0))
    def _kld():
        mu = mu_ref[...].astype(jnp.float32)
        lv = logvar_ref[...].astype(jnp.float32)
        kld = -0.5 * jnp.sum(1.0 + lv - mu * mu - jnp.exp(lv))
        kld_ref[...] = jnp.zeros_like(kld_ref) + kld

    def _slab_diff(i):
        r0 = pl.multiple_of(i * slab_rows, slab_rows)
        d = (dec_ref[pl.ds(r0, slab_rows), :].astype(jnp.float32)
             - y_ref[pl.ds(r0, slab_rows), :].astype(jnp.float32))
        return r0, d

    def _fold8(a):
        out = a[0:8, :]
        for j in range(1, slab_rows // 8):
            out = out + a[8 * j:8 * (j + 1), :]
        return out

    acc0 = jnp.zeros((slab_rows, cols), jnp.float32)

    def _fast_body(i, acc):
        _, d = _slab_diff(i)
        return acc + d * d

    def _run_fast():
        acc = lax.fori_loop(0, n_slabs, _fast_body, acc0, unroll=unroll)
        sse_ref[0] += _fold8(acc)

    if not may_be_partial:
        _run_fast()
        return

    # Ragged case: some rows of this tile (or the whole duplicated step on the
    # 2-way split) lie past the true row count -> mask the squared diff.
    step = ci * tiles_per_core + t
    valid = jnp.clip(rows_valid - step * tile_rows, 0, tile_rows)

    @pl.when(valid == tile_rows)
    def _full_tile():
        _run_fast()

    @pl.when(jnp.logical_and(valid > 0, valid < tile_rows))
    def _ragged_tile():
        def body(i, acc):
            r0, d = _slab_diff(i)
            row = lax.broadcasted_iota(jnp.int32, (slab_rows, cols), 0) + r0
            return acc + jnp.where(row < valid, d * d, 0.0)
        acc = lax.fori_loop(0, n_slabs, body, acc0, unroll=unroll)
        sse_ref[0] += _fold8(acc)


def vae_loss(decoder_output, mu_q, logvar_q, y_true, anneal, batch_size,
             dataset_size, kld_weight, *, cols=1024):
    """Pallas TPU forward pass of VAELoss; returns (total, recon, kld) f32."""
    del batch_size  # unused by the reference forward pass
    assert cols % 128 == 0

    n = int(decoder_output.size)
    assert int(y_true.size) == n and n > 0

    ncore, max_tile_rows, vmem_limit = _chip_config()

    # Dtype-aware slab: one packed vreg of sublanes per slice
    # (8 rows f32, 16 bf16/f16, 32 int8/fp8).
    item = min(jnp.dtype(decoder_output.dtype).itemsize,
               jnp.dtype(y_true.dtype).itemsize)
    slab_rows = 8 * max(1, 4 // max(1, item))

    # Lane-dense streaming layout (rows_p, cols) in the native dtype.
    rows_p = _round_up(_cdiv(n, cols), slab_rows)
    padded_n = rows_p * cols
    dec_flat = decoder_output.reshape(-1)
    y_flat = y_true.reshape(-1)
    if padded_n != n:
        # TODO(synk): for ragged n this is still one HBM copy per operand; a
        # manual-DMA tail would avoid it but the pad here is < slab_rows*cols.
        dec_flat = jnp.pad(dec_flat, (0, padded_n - n))
        y_flat = jnp.pad(y_flat, (0, padded_n - n))
    dec2 = dec_flat.reshape(rows_p, cols)
    y2 = y_flat.reshape(rows_p, cols)

    b = mu_q.shape[0]
    mu2 = mu_q.reshape(b, -1)
    lv2 = logvar_q.reshape(b, -1)

    tile_rows = min(max_tile_rows, rows_p)          # multiple of slab_rows
    total_tiles = _cdiv(rows_p, tile_rows)
    ncore = min(ncore, total_tiles)
    tiles_per_core = _cdiv(total_tiles, ncore)
    grid = (ncore, tiles_per_core)

    exact_split = ncore * tiles_per_core == total_tiles
    may_be_partial = (rows_p % tile_rows != 0) or (not exact_split)

    if exact_split:
        stream_map = lambda ci, ti: (ci * tiles_per_core + ti, 0)
    else:
        last_tile = total_tiles - 1
        stream_map = lambda ci, ti: (
            jnp.minimum(ci * tiles_per_core + ti, last_tile), 0)

    kernel = functools.partial(
        _vae_loss_kernel,
        tile_rows=tile_rows,
        slab_rows=slab_rows,
        tiles_per_core=tiles_per_core,
        rows_valid=rows_p,
        may_be_partial=may_be_partial,
        unroll=max(1, min(8, tile_rows // slab_rows)))

    mu_elems = int(mu2.size)
    cost = pl.CostEstimate(
        flops=3 * n + 6 * mu_elems,
        transcendentals=mu_elems,
        bytes_accessed=int(
            n * jnp.dtype(decoder_output.dtype).itemsize
            + n * jnp.dtype(y_true.dtype).itemsize
            + mu2.size * jnp.dtype(mu2.dtype).itemsize
            + lv2.size * jnp.dtype(lv2.dtype).itemsize))

    sse_part, kld_part = pl.pallas_call(
        kernel,
        out_shape=(
            jax.ShapeDtypeStruct((ncore, 8, cols), jnp.float32),
            jax.ShapeDtypeStruct((ncore, 8, 128), jnp.float32),
        ),
        grid_spec=pltpu.PrefetchScalarGridSpec(
            num_scalar_prefetch=0,
            grid=grid,
            in_specs=[
                pl.BlockSpec((tile_rows, cols), stream_map),
                pl.BlockSpec((tile_rows, cols), stream_map),
                pl.BlockSpec(mu2.shape, lambda ci, ti: (0, 0)),   # resident
                pl.BlockSpec(lv2.shape, lambda ci, ti: (0, 0)),   # resident
            ],
            out_specs=[
                pl.BlockSpec((1, 8, cols), lambda ci, ti: (ci, 0, 0)),
                pl.BlockSpec((1, 8, 128), lambda ci, ti: (ci, 0, 0)),
            ],
        ),
        compiler_params=pltpu.CompilerParams(
            dimension_semantics=("parallel", "arbitrary"),
            vmem_limit_bytes=vmem_limit),
        cost_estimate=cost,
    )(dec2, y2, mu2, lv2)

    # Tiny final combination in the wrapper.
    sse = jnp.sum(sse_part)
    kld = kld_part[0, 0, 0]
    recon_loss = sse * jnp.float32(1.0 / n)      # 1/N formed in f64 host math
    total_loss = recon_loss + jnp.float32(kld_weight * anneal) * (
        kld / jnp.float32(dataset_size))
    return total_loss, recon_loss, kld


if __name__ == "__main__":
    key = jax.random.PRNGKey(0)
    k1, k2, k3, k4 = jax.random.split(key, 4)

    # Shapes implied by the module: decoder output / target are image-like
    # (N, C, H, W); mu/logvar are (N, latent).
    B, C, H, W = 2, 4, 16, 16
    LATENT = 32

    decoder_output = jax.random.normal(k1, (B, C, H, W), dtype=jnp.float32)
    y_true = jax.random.normal(k2, (B, C, H, W), dtype=jnp.float32)
    mu_q = jax.random.normal(k3, (B, LATENT), dtype=jnp.float32)
    logvar_q = 0.1 * jax.random.normal(k4, (B, LATENT), dtype=jnp.float32)

    kld_weight = 0.5      # module __init__ arg
    anneal = 0.3
    batch_size = B
    dataset_size = 1000.0

    total_loss, recon_loss, kld = vae_loss(
        decoder_output, mu_q, logvar_q, y_true,
        anneal, batch_size, dataset_size, kld_weight)
    jax.block_until_ready((total_loss, recon_loss, kld))

    # Pure-JAX reference check (same math as the PyTorch module).
    kld_ref = -0.5 * jnp.sum(1.0 + logvar_q - mu_q**2 - jnp.exp(logvar_q))
    recon_ref = jnp.mean((decoder_output - y_true) ** 2)
    total_ref = recon_ref + kld_weight * anneal * (kld_ref / dataset_size)
    assert jnp.allclose(total_loss, total_ref, rtol=1e-5, atol=1e-5)
    assert jnp.allclose(recon_loss, recon_ref, rtol=1e-5, atol=1e-5)
    assert jnp.allclose(kld, kld_ref, rtol=1e-5, atol=1e-5)

    print("KERNEL_OK")
</pallas_src>

<mosaic_0001>
module attributes {stable_mosaic.version = 11 : i64} {
  func.func @_vae_loss_kernel(%arg0: i32, %arg1: i32, %arg2: memref<8x1024xf32, #tpu.memory_space<vmem>>, %arg3: memref<8x1024xf32, #tpu.memory_space<vmem>>, %arg4: memref<2x32xf32, #tpu.memory_space<vmem>>, %arg5: memref<2x32xf32, #tpu.memory_space<vmem>>, %arg6: memref<1x8x1024xf32, #tpu.memory_space<vmem>>, %arg7: memref<1x8x128xf32, #tpu.memory_space<vmem>>) attributes {dimension_semantics = [#tpu.dimension_semantics<parallel>, #tpu.dimension_semantics<arbitrary>], iteration_bounds = array<i64: 1, 1>, scalar_prefetch = 0 : i64, scratch_operands = 0 : i64, tpu.core_type = #tpu.core_type<tc>, window_params = [{transform_indices = @transform_0, window_bounds = array<i64: 8, 1024>}, {transform_indices = @transform_1, window_bounds = array<i64: 8, 1024>}, {pipeline_mode = #tpu.pipeline_mode<synchronous>, transform_indices = @transform_2, window_bounds = array<i64: 2, 32>}, {pipeline_mode = #tpu.pipeline_mode<synchronous>, transform_indices = @transform_3, window_bounds = array<i64: 2, 32>}, {transform_indices = @transform_4, window_bounds = array<i64: 1, 8, 1024>}, {transform_indices = @transform_5, window_bounds = array<i64: 1, 8, 128>}]} {
    %c0_i32 = arith.constant 0 : i32
    %0 = arith.cmpi eq, %arg1, %c0_i32 : i32
    %1 = arith.extui %0 : i1 to i32
    %c0_i32_0 = arith.constant 0 : i32
    %2 = arith.cmpi ne, %1, %c0_i32_0 : i32
    scf.if %2 {
      %cst_12 = arith.constant 0.000000e+00 : f32
      %24 = vector.broadcast %cst_12 : f32 to vector<1x8x1024xf32>
      %c0_13 = arith.constant 0 : index
      %c0_14 = arith.constant 0 : index
      %c0_15 = arith.constant 0 : index
      %25 = vector.load %arg6[%c0_13, %c0_14, %c0_15] : memref<1x8x1024xf32, #tpu.memory_space<vmem>>, vector<1x8x1024xf32>
      tpu.vector_store %arg6[%c0_13, %c0_14, %c0_15], %24 {strides = array<i32>} : memref<1x8x1024xf32, #tpu.memory_space<vmem>>, vector<1x8x1024xf32>,
      %cst_16 = arith.constant 0.000000e+00 : f32
      %26 = vector.broadcast %cst_16 : f32 to vector<1x8x128xf32>
      %c0_17 = arith.constant 0 : index
      %c0_18 = arith.constant 0 : index
      %c0_19 = arith.constant 0 : index
      %27 = vector.load %arg7[%c0_17, %c0_18, %c0_19] : memref<1x8x128xf32, #tpu.memory_space<vmem>>, vector<1x8x128xf32>
      tpu.vector_store %arg7[%c0_17, %c0_18, %c0_19], %26 {strides = array<i32>} : memref<1x8x128xf32, #tpu.memory_space<vmem>>, vector<1x8x128xf32>,
    } else {
    }
    %c0_i32_1 = arith.constant 0 : i32
    %3 = arith.cmpi eq, %arg1, %c0_i32_1 : i32
    %c0_i32_2 = arith.constant 0 : i32
    %4 = arith.cmpi eq, %arg0, %c0_i32_2 : i32
    %5 = arith.andi %3, %4 : i1
    %6 = arith.extui %5 : i1 to i32
    %c0_i32_3 = arith.constant 0 : i32
    %7 = arith.cmpi ne, %6, %c0_i32_3 : i32
    scf.if %7 {
      %c0_12 = arith.constant 0 : index
      %c0_13 = arith.constant 0 : index
      %24 = vector.load %arg4[%c0_12, %c0_13] : memref<2x32xf32, #tpu.memory_space<vmem>>, vector<2x32xf32>
      %c0_14 = arith.constant 0 : index
      %c0_15 = arith.constant 0 : index
      %25 = vector.load %arg5[%c0_14, %c0_15] : memref<2x32xf32, #tpu.memory_space<vmem>>, vector<2x32xf32>
      %cst_16 = arith.constant 1.000000e+00 : f32
      %26 = vector.broadcast %cst_16 : f32 to vector<2x32xf32>
      %27 = arith.addf %26, %25 : vector<2x32xf32>
      %28 = arith.mulf %24, %24 : vector<2x32xf32>
      %29 = arith.subf %27, %28 : vector<2x32xf32>
      %30 = math.exp %25 : vector<2x32xf32>
      %31 = arith.subf %29, %30 : vector<2x32xf32>
      %32 = vector.shape_cast %31 : vector<2x32xf32> to vector<1x2x32xf32>
      %cst_17 = arith.constant dense<0.000000e+00> : vector<1xf32>
      %33 = vector.multi_reduction <add>, %32, %cst_17 [1, 2] : vector<1x2x32xf32> to vector<1xf32>
      %34 = vector.shape_cast %33 : vector<1xf32> to vector<1x1x1xf32>
      %35 = vector.extract %34[0, 0, 0] : f32 from vector<1x1x1xf32>
      %cst_18 = arith.constant -5.000000e-01 : f32
      %36 = arith.mulf %cst_18, %35 : f32
      %cst_19 = arith.constant 0.000000e+00 : f32
      %37 = vector.broadcast %cst_19 : f32 to vector<1x8x128xf32>
      %38 = vector.broadcast %36 : f32 to vector<1x8x128xf32>
      %39 = arith.addf %37, %38 : vector<1x8x128xf32>
      %c0_20 = arith.constant 0 : index
      %c0_21 = arith.constant 0 : index
      %c0_22 = arith.constant 0 : index
      %40 = vector.load %arg7[%c0_20, %c0_21, %c0_22] : memref<1x8x128xf32, #tpu.memory_space<vmem>>, vector<1x8x128xf32>
      tpu.vector_store %arg7[%c0_20, %c0_21, %c0_22], %39 {strides = array<i32>} : memref<1x8x128xf32, #tpu.memory_space<vmem>>, vector<1x8x128xf32>,
    } else {
    }
    %cst = arith.constant 0.000000e+00 : f32
    %8 = vector.broadcast %cst : f32 to vector<8x1024xf32>
    %c0_i32_4 = arith.constant 0 : i32
    %c8_i32 = arith.constant 8 : i32
    %9 = arith.muli %c0_i32_4, %c8_i32 : i32
    %10 = tpu.assume_multiple %9, 8 : i32
    %11 = arith.index_cast %10 : i32 to index
    %c0 = arith.constant 0 : index
    %12 = vector.load %arg2[%11, %c0] : memref<8x1024xf32, #tpu.memory_space<vmem>>, vector<8x1024xf32>
    %13 = arith.index_cast %10 : i32 to index
    %c0_5 = arith.constant 0 : index
    %14 = vector.load %arg3[%13, %c0_5] : memref<8x1024xf32, #tpu.memory_space<vmem>>, vector<8x1024xf32>
    %15 = arith.subf %12, %14 : vector<8x1024xf32>
    %16 = arith.mulf %15, %15 : vector<8x1024xf32>
    %17 = arith.addf %8, %16 : vector<8x1024xf32>
    %c1_i32 = arith.constant 1 : i32
    %c0_6 = arith.constant 0 : index
    %c0_7 = arith.constant 0 : index
    %c0_8 = arith.constant 0 : index
    %18 = vector.load %arg6[%c0_6, %c0_7, %c0_8] : memref<1x8x1024xf32, #tpu.memory_space<vmem>>, vector<1x8x1024xf32>
    %19 = vector.shape_cast %18 : vector<1x8x1024xf32> to vector<8x1024xf32>
    %20 = arith.addf %19, %17 : vector<8x1024xf32>
    %c0_9 = arith.constant 0 : index
    %c0_10 = arith.constant 0 : index
    %c0_11 = arith.constant 0 : index
    %21 = vector.load %arg6[%c0_9, %c0_10, %c0_11] : memref<1x8x1024xf32, #tpu.memory_space<vmem>>, vector<1x8x1024xf32>
    %22 = vector.shape_cast %21 : vector<1x8x1024xf32> to vector<8x1024xf32>
    %23 = vector.shape_cast %20 : vector<8x1024xf32> to vector<1x8x1024xf32>
    tpu.vector_store %arg6[%c0_9, %c0_10, %c0_11], %23 {strides = array<i32>} : memref<1x8x1024xf32, #tpu.memory_space<vmem>>, vector<1x8x1024xf32>,
    return
  }
  func.func @transform_0(%arg0: i32, %arg1: i32) -> (i32, i32) {
    %c1_i32 = arith.constant 1 : i32
    %0 = arith.muli %arg0, %c1_i32 : i32
    %1 = arith.addi %0, %arg1 : i32
    %c0_i32 = arith.constant 0 : i32
    %c0_i32_0 = arith.constant 0 : i32
    return %1, %c0_i32 : i32, i32
  }
  func.func @transform_1(%arg0: i32, %arg1: i32) -> (i32, i32) {
    %c1_i32 = arith.constant 1 : i32
    %0 = arith.muli %arg0, %c1_i32 : i32
    %1 = arith.addi %0, %arg1 : i32
    %c0_i32 = arith.constant 0 : i32
    %c0_i32_0 = arith.constant 0 : i32
    return %1, %c0_i32 : i32, i32
  }
  func.func @transform_2(%arg0: i32, %arg1: i32) -> (i32, i32) {
    %c0_i32 = arith.constant 0 : i32
    %c0_i32_0 = arith.constant 0 : i32
    %c0_i32_1 = arith.constant 0 : i32
    return %c0_i32, %c0_i32_0 : i32, i32
  }
  func.func @transform_3(%arg0: i32, %arg1: i32) -> (i32, i32) {
    %c0_i32 = arith.constant 0 : i32
    %c0_i32_0 = arith.constant 0 : i32
    %c0_i32_1 = arith.constant 0 : i32
    return %c0_i32, %c0_i32_0 : i32, i32
  }
  func.func @transform_4(%arg0: i32, %arg1: i32) -> (i32, i32, i32) {
    %c0_i32 = arith.constant 0 : i32
    %c0_i32_0 = arith.constant 0 : i32
    %c0_i32_1 = arith.constant 0 : i32
    return %arg0, %c0_i32, %c0_i32_0 : i32, i32, i32
  }
  func.func @transform_5(%arg0: i32, %arg1: i32) -> (i32, i32, i32) {
    %c0_i32 = arith.constant 0 : i32
    %c0_i32_0 = arith.constant 0 : i32
    %c0_i32_1 = arith.constant 0 : i32
    return %arg0, %c0_i32, %c0_i32_0 : i32, i32, i32
  }
}

</mosaic_0001>

<bundles_post_ra>
// kernel: tpu_custom_call.1
= control target key start
LH: loop header
LB: loop body
LE: loop exit
PB: predicated region body
PF: predicated region fallthrough
CT: control target
= control target key end

     0   :  { %11 = vsyncpa [#allocation3], 0  ;;  %s344_s0 = inlined_call_operand.hbm [shape: f32[8,1024], index: 0, kind: input, shape index: {}]   ;;  %s345_s1 = inlined_call_operand.hbm [shape: f32[8,1024], index: 1, kind: input, shape index: {}]   ;;  %s346_s2 = inlined_call_operand.vmem [shape: f32[2,32], index: 2, kind: input, shape index: {}]   ;;  %s347_s3 = inlined_call_operand.vmem [shape: f32[2,32], index: 3, kind: input, shape index: {}]   ;;  %s348_s4 = inlined_call_operand.hbm [shape: f32[1,8,1024], index: 4, kind: output, shape index: {0}]   ;;  %s349_s5 = inlined_call_operand.hbm [shape: f32[1,8,128], index: 5, kind: output, shape index: {1}]  }
   0x1   :  { %12 = vsyncpa [#allocation6], 0 }
   0x2   :  { %13 = vsyncpa [#allocation4], 0 }
   0x3   :  { %14 = vsyncpa [#allocation9], 0  ;;  %s292_s18 = smov [#allocation2]   ;;  %s293_s20 = smov [#allocation5]  }
   0x4   :  { %s25_s19 = sshll.u32 %s292_s18, 4  ;;  %s39_s21 = sshll.u32 %s293_s20, 4  ;;  %s26_s19 = int_to_ptr.vmem [resolvable:$true] %s25_s19  ;;  %s40_s21 = int_to_ptr.vmem [resolvable:$true] %s39_s21 }
   0x5   :  { %s212_s22 = scalar_lea.vmem %s26_s19, 1024  ;;  %p217_p1 = scmp.lt.s32.totalorder %s26_s19, %s26_s19 }
   0x6   :  { %p213_p0 = scmp.ne.s32.totalorder %s26_s19, %s212_s22  ;;  %p218_p2 = scmp.lt.s32.totalorder %s212_s22, %s212_s22 }
   0x8   :  { %p219_p3 = por %p218_p2, %p217_p1 }
   0xa   :  { %p220_p4 = pnand %p219_p3, %p213_p0 }
   0xc   :  { %223 = shalt.err (!%p220_p4)
}
   0xd   :  { %28 = dma.hbm_to_vmem [thread:$0]  %s344_s0, 1024, %s26_s19, [#allocation3]  }
   0xe   :  { %s232_s25 = scalar_lea.vmem %s40_s21, 1024  ;;  %p237_p6 = scmp.lt.s32.totalorder %s40_s21, %s40_s21 }
   0xf   :  { %p233_p5 = scmp.ne.s32.totalorder %s40_s21, %s232_s25  ;;  %p238_p7 = scmp.lt.s32.totalorder %s232_s25, %s232_s25 }
  0x11   :  { %p239_p8 = por %p238_p7, %p237_p6 }
  0x13   :  { %p240_p9 = pnand %p239_p8, %p233_p5 }
  0x15   :  { %243 = shalt.err (!%p240_p9)
}
  0x16   :  { %42 = dma.hbm_to_vmem [thread:$0]  %s345_s1, 1024, %s40_s21, [#allocation6]  }
  0x17   :  { %284 = dma.done.wait [#allocation3], 1024  }
  0x18   :  { %285 = vsyncadd [#allocation3], 4294966272 }
  0x19   :  { %286 = dma.done.wait [#allocation6], 1024  }
  0x1a   :  { %287 = vsyncadd [#allocation6], 4294966272  ;;  %v74_v0 = vld [vmem:[%s347_s3] sm:$0x3]  ;;  %vm81_vm0 = vcmask 254976   ;;  %v100_v10 = vld [vmem:[#allocation2 + $0x8] sm:$0xff] }
  0x1b   :  { %v78_v1 = vmul.f32 1.442695, %v74_v0  ;;  %v73_v2 = vld [vmem:[%s346_s2] sm:$0x3]  ;;  %v75_v3 = vadd.f32 1.0, %v74_v0  ;;  %v101_v11 = vld [vmem:[#allocation2 + $0x10] sm:$0xff] }
  0x1c   :  { %v76_v4 = vmul.f32 %v73_v2, %v73_v2  ;;  %v99_v9 = vld [vmem:[#allocation2] sm:$0xff]  ;;  %v102_v12 = vld [vmem:[#allocation2 + $0x18] sm:$0xff]  ;;  %v104_v14 = vld [vmem:[#allocation2 + $0x28] sm:$0xff]  ;;  %s294_s1 = smov [#allocation7]  }
  0x1d   :  { %202 = vpow2.f32 %v78_v1  ;;  %v103_v13 = vld [vmem:[#allocation2 + $0x20] sm:$0xff]  ;;  %v105_v15 = vld [vmem:[#allocation2 + $0x30] sm:$0xff]  ;;  %v106_v16 = vld [vmem:[#allocation2 + $0x38] sm:$0xff]  ;;  %s171_s2 = sshll.u32 %s294_s1, 4  ;;  %s172_s2 = int_to_ptr.vmem [resolvable:$true] %s171_s2 }
  0x1e   :  { %v77_v5 = vsub.f32 %v75_v3, %v76_v4  ;;  %v109_v17 = vld [vmem:[#allocation5] sm:$0xff]  ;;  %v110_v18 = vld [vmem:[#allocation5 + $0x8] sm:$0xff]  ;;  %v111_v19 = vld [vmem:[#allocation5 + $0x10] sm:$0xff]  ;;  %s244_s3 = scalar_lea.vmem %s172_s2, 1024  ;;  %p249_p11 = scmp.lt.s32.totalorder %s172_s2, %s172_s2 }
  0x1f   :  { %v112_v20 = vld [vmem:[#allocation5 + $0x18] sm:$0xff]  ;;  %v117_v21 = vsub.f32 %v99_v9, %v109_v17  ;;  %v113_v22 = vld [vmem:[#allocation5 + $0x20] sm:$0xff]  ;;  %v114_v23 = vld [vmem:[#allocation5 + $0x28] sm:$0xff]  ;;  %v118_v25 = vsub.f32 %v100_v10, %v110_v18  ;;  %v119_v26 = vsub.f32 %v101_v11, %v111_v19  ;;  %p245_p10 = scmp.ne.s32.totalorder %s172_s2, %s244_s3  ;;  %p250_p12 = scmp.lt.s32.totalorder %s244_s3, %s244_s3 }
  0x20   :  { %v115_v24 = vld [vmem:[#allocation5 + $0x30] sm:$0xff]  ;;  %v120_v27 = vsub.f32 %v102_v12, %v112_v20  ;;  %v116_v28 = vld [vmem:[#allocation5 + $0x38] sm:$0xff]  ;;  %v121_v29 = vsub.f32 %v103_v13, %v113_v22  ;;  %v122_v30 = vsub.f32 %v104_v14, %v114_v23 }
  0x21   :  { %v123_v31 = vsub.f32 %v105_v15, %v115_v24  ;;  %v125_v32 = vmul.f32 %v117_v21, %v117_v21  ;;  %v124_v33 = vsub.f32 %v106_v16, %v116_v28  ;;  %v126_v34 = vmul.f32 %v118_v25, %v118_v25  ;;  %p251_p13 = por %p250_p12, %p249_p11 }
  0x22   :  { %v127_v35 = vmul.f32 %v119_v26, %v119_v26  ;;  %v128_v36 = vmul.f32 %v120_v27, %v120_v27  ;;  %v129_v37 = vmul.f32 %v121_v29, %v121_v29  ;;  %v130_v38 = vmul.f32 %v122_v30, %v122_v30 }
  0x23   :  { %v131_v39 = vmul.f32 %v123_v31, %v123_v31  ;;  %v132_v40 = vmul.f32 %v124_v33, %v124_v33  ;;  %157 = vst [vmem:[#allocation7] sm:$0xff] %v125_v32  ;;  %158 = vst [vmem:[#allocation7 + $0x8] sm:$0xff] %v126_v34  ;;  %p252_p0 = pnand %p251_p13, %p245_p10 }
  0x24   :  { %159 = vst [vmem:[#allocation7 + $0x10] sm:$0xff] %v127_v35  ;;  %160 = vst [vmem:[#allocation7 + $0x18] sm:$0xff] %v128_v36 }
  0x25   :  { %161 = vst [vmem:[#allocation7 + $0x20] sm:$0xff] %v129_v37  ;;  %162 = vst [vmem:[#allocation7 + $0x28] sm:$0xff] %v130_v38 }
  0x26   :  { %163 = vst [vmem:[#allocation7 + $0x30] sm:$0xff] %v131_v39  ;;  %164 = vst [vmem:[#allocation7 + $0x38] sm:$0xff] %v132_v40 }
  0x2a   :  { %v203_v6 = vpop.eup %202 }
  0x2b   :  { %v80_v7 = vsub.f32 %v77_v5, %v203_v6 }
  0x2d   :  { %v82_v8 = vsel %vm81_vm0, %v80_v7, 0.0 }
  0x2e   :  { %83 = vadd.xlane.f32.xlu0 %v82_v8 }
  0x2f   :  { %255 = shalt.err (!%p252_p0)
}
  0x30   :  { %174 = dma.vmem_to_hbm [thread:$0]  %s172_s2, 1024, %s348_s4, [#allocation4]  }
  0x31   :  { %s295_s8 = smov [#allocation8]  }
  0x32   :  { %s181_s9 = sshll.u32 %s295_s8, 4  ;;  %s182_s9 = int_to_ptr.vmem [resolvable:$true] %s181_s9 }
  0x33   :  { %s264_s12 = scalar_lea.vmem %s182_s9, 128  ;;  %p269_p2 = scmp.lt.s32.totalorder %s182_s9, %s182_s9 }
  0x34   :  { %p265_p1 = scmp.ne.s32.totalorder %s182_s9, %s264_s12  ;;  %p270_p3 = scmp.lt.s32.totalorder %s264_s12, %s264_s12 }
  0x36   :  { %p271_p4 = por %p270_p3, %p269_p2 }
  0x38   :  { %p272_p5 = pnand %p271_p4, %p265_p1 }
  0xb7   :  { %v84_v41 = vpop.xlane.xlu0 %83 }
  0xb8   :  { %v85_v42 = vrot.slane %v84_v41, 4 }
  0xba   :  { %v86_v43 = vadd.f32 %v85_v42, %v84_v41 }
  0xbc   :  { %v87_v44 = vrot.slane %v86_v43, 2 }
  0xbe   :  { %v88_v45 = vadd.f32 %v87_v44, %v86_v43 }
  0xc0   :  { %v89_v46 = vrot.slane %v88_v45, 1 }
  0xc2   :  { %v90_v47 = vadd.f32 %v89_v46, %v88_v45 }
  0xc4   :  { %195 = vpush %v90_v47 }
  0xf5   :  { %s196_s10 = spop %195 }
  0xf6   :  { %s92_s11 = smul.f32 -0.5, %s196_s10 }
  0xf8   :  { %v93_v48 = vstv %s92_s11 }
  0xf9   :  { %95 = vst [vmem:[#allocation8] sm:$0xff] %v93_v48 }
  0xfa   :  { %275 = shalt.err (!%p272_p5)
}
  0xfb   :  { %184 = dma.vmem_to_hbm [thread:$0]  %s182_s9, 128, %s349_s5, [#allocation9]  }
  0xfc   :  { %288 = dma.done.wait [#allocation4], 1024  }
  0xfd   :  { %289 = vsyncadd [#allocation4], 4294966272 }
  0xfe   :  { %290 = dma.done.wait [#allocation9], 128  }
  0xff   :  { %291 = vsyncadd [#allocation9], 4294967168 }
 0x100   :  { %191 = vsyncpa [#allocation3], 1 }
 0x101   :  { %192 = vsyncpa [#allocation6], 1 }
 0x102   :  { %193 = vsyncpa [#allocation4], 1 }
 0x103   :  { %194 = vsyncpa [#allocation9], 1 }

</bundles_post_ra>
